<compile_context>
chip_gen: v7x
topology: tpu7x:2x2x1
jax: 0.10.0
libtpu: 0.0.40
codegen_flags: <defaults>
</compile_context>

<pallas_src>
from typing import NamedTuple

import jax
import jax.numpy as jnp
from jax.experimental import pallas as pl
from jax.experimental.pallas import tpu as pltpu


def _round_up(x, m):
    return (x + m - 1) // m * m


def _default_vmem_limit_bytes():
    # Leave ~8 MiB headroom below physical VMEM; cap at 112 MiB (v5e/v6e) and
    # fall back conservatively (fits v7x's 64 MiB) if the query fails.
    try:
        cap = int(pltpu.get_tpu_info().vmem_capacity_bytes)
    except Exception:
        cap = 64 * 1024 * 1024
    return max(32 * 1024 * 1024, min(cap - 8 * 1024 * 1024, 112 * 1024 * 1024))


# ----------------------------------------------------------------------------- kernels

def _ff_kernel_accum_out(x_ref, w1_ref, b1_ref, w2_ref, b2_ref, o_ref):
    """f32-output variant: accumulate directly into the resident o_ref block."""
    # x_ref: (tm, Dp)  w1_ref: (Dp, Hk)  b1_ref: (1, Hk) f32
    # w2_ref: (Hk, Dp) b2_ref: (1, Dp) f32  o_ref: (tm, Dp) f32 (revisited across k)
    k = pl.program_id(1)

    h = jnp.dot(x_ref[...], w1_ref[...], preferred_element_type=jnp.float32)
    h = jnp.maximum(h + b1_ref[...], 0.0)            # bias + relu (dropout: identity)
    contrib = jnp.dot(
        h.astype(w2_ref.dtype), w2_ref[...], preferred_element_type=jnp.float32
    )

    @pl.when(k == 0)
    def _():
        o_ref[...] = contrib

    @pl.when(k > 0)
    def _():
        o_ref[...] += contrib

    @pl.when(k == pl.num_programs(1) - 1)
    def _():
        o_ref[...] += b2_ref[...]


def _ff_kernel_scratch(x_ref, w1_ref, b1_ref, w2_ref, b2_ref, o_ref, acc_ref):
    """Narrow-output variant: f32 VMEM accumulator, cast to o_ref.dtype at the end."""
    k = pl.program_id(1)

    @pl.when(k == 0)
    def _():
        acc_ref[...] = jnp.zeros_like(acc_ref)

    h = jnp.dot(x_ref[...], w1_ref[...], preferred_element_type=jnp.float32)
    h = jnp.maximum(h + b1_ref[...], 0.0)            # bias + relu (dropout: identity)
    acc_ref[...] += jnp.dot(
        h.astype(w2_ref.dtype), w2_ref[...], preferred_element_type=jnp.float32
    )

    @pl.when(k == pl.num_programs(1) - 1)
    def _():
        o_ref[...] = (acc_ref[...] + b2_ref[...]).astype(o_ref.dtype)


# ----------------------------------------------------------------------------- params

class FFParams(NamedTuple):
    w1p: jax.Array   # (Dp, Hp) compute_dtype
    b1p: jax.Array   # (1, Hp)  f32
    w2p: jax.Array   # (Hp, Dp) compute_dtype
    b2p: jax.Array   # (1, Dp)  f32
    D: int
    H: int
    Dp: int
    Hk: int
    n_k: int


def prepare_params(w1, b1, w2, b2, *, compute_dtype=jnp.bfloat16, tk_h=512):
    """Pad + cast weights once (hoisted out of the per-forward path).

    w1: (D, H)  b1: (1, H)  w2: (H, D)  b2: (1, D).
    tk_h is an upper bound on the hidden-dim slab; the actual Hk is a balanced
    multiple of 128 so padding waste on awkward H is minimal.
    """
    D, H = w1.shape
    assert w2.shape == (H, D)
    Dp = _round_up(D, 128)
    H128 = _round_up(H, 128)
    n_k = max(1, pl.cdiv(H128, tk_h))
    Hk = _round_up(pl.cdiv(H128, n_k), 128)
    Hp = Hk * n_k

    # Zero padding: padded K-columns/rows contribute exactly zero (b1 pad is zero,
    # so padded hidden columns give relu(0)=0; w2 pad rows are zero as a backstop).
    w1p = jnp.pad(w1.astype(compute_dtype), ((0, Dp - D), (0, Hp - H)))
    b1p = jnp.pad(b1.astype(jnp.float32).reshape(1, H), ((0, 0), (0, Hp - H)))
    w2p = jnp.pad(w2.astype(compute_dtype), ((0, Hp - H), (0, Dp - D)))
    b2p = jnp.pad(b2.astype(jnp.float32).reshape(1, D), ((0, 0), (0, Dp - D)))
    return FFParams(w1p, b1p, w2p, b2p, D, H, Dp, Hk, n_k)


# ----------------------------------------------------------------------------- wrapper

def feed_forward(x, params: FFParams, *, tm=512, vmem_limit_bytes=None):
    """x: (B, S, D). Returns (B, S, D) in x.dtype."""
    B, S, D = x.shape
    assert D == params.D, (D, params.D)
    N = B * S
    Dp, Hk, n_k = params.Dp, params.Hk, params.n_k
    out_dtype = jnp.dtype(x.dtype)

    # Row tiling: multiple of 8, balanced, and >=2 tiles when N allows
    # (keeps both v7x TensorCores busy via the "parallel" grid axis).
    Np8 = _round_up(N, 8)
    n_rows = max(1, pl.cdiv(Np8, tm))
    if n_rows == 1 and Np8 >= 16:
        n_rows = 2
    tm_eff = _round_up(pl.cdiv(Np8, n_rows), 8)
    Np = tm_eff * n_rows

    # Activations: cast to the (bf16) compute dtype in the wrapper, pad lane-dense.
    x2p = jnp.pad(
        x.reshape(N, D).astype(params.w1p.dtype), ((0, Np - N), (0, Dp - D))
    )

    use_scratch = out_dtype != jnp.dtype(jnp.float32)
    kernel = _ff_kernel_scratch if use_scratch else _ff_kernel_accum_out
    scratch = [pltpu.VMEM((tm_eff, Dp), jnp.float32)] if use_scratch else []

    if vmem_limit_bytes is None:
        vmem_limit_bytes = _default_vmem_limit_bytes()

    cost = pl.CostEstimate(
        flops=4 * N * params.D * params.H,          # two N x D x H matmuls
        transcendentals=0,
        bytes_accessed=int(
            x2p.size * x2p.dtype.itemsize
            + params.w1p.size * params.w1p.dtype.itemsize
            + params.b1p.size * params.b1p.dtype.itemsize
            + params.w2p.size * params.w2p.dtype.itemsize
            + params.b2p.size * params.b2p.dtype.itemsize
            + Np * Dp * out_dtype.itemsize
        ),
    )

    out = pl.pallas_call(
        kernel,
        out_shape=jax.ShapeDtypeStruct((Np, Dp), out_dtype),
        grid_spec=pltpu.PrefetchScalarGridSpec(
            num_scalar_prefetch=0,
            grid=(n_rows, n_k),
            in_specs=[
                pl.BlockSpec((tm_eff, Dp), lambda i, k: (i, 0)),  # x rows (resident over k)
                pl.BlockSpec((Dp, Hk), lambda i, k: (0, k)),      # w1 H-slab
                pl.BlockSpec((1, Hk), lambda i, k: (0, k)),       # b1 H-slab (f32)
                pl.BlockSpec((Hk, Dp), lambda i, k: (k, 0)),      # w2 H-slab
                pl.BlockSpec((1, Dp), lambda i, k: (0, 0)),       # b2 (tiny, constant)
            ],
            out_specs=pl.BlockSpec((tm_eff, Dp), lambda i, k: (i, 0)),
            scratch_shapes=scratch,
        ),
        compiler_params=pltpu.CompilerParams(
            dimension_semantics=("parallel", "arbitrary"),
            vmem_limit_bytes=vmem_limit_bytes,
        ),
        cost_estimate=cost,
    )(x2p, params.w1p, params.b1p, params.w2p, params.b2p)

    return out[:N, :D].reshape(B, S, D)


# ----------------------------------------------------------------------------- init / demo

def init_params(key, input_dim, mult=4.0, dtype=jnp.float32):
    """Deterministic init matching nn.Linear shapes (activation='relu' -> no GLU doubling)."""
    ff_hid_dim = int(input_dim * mult)
    k1, k2, k3, k4 = jax.random.split(key, 4)
    bnd1 = 1.0 / (input_dim ** 0.5)
    bnd2 = 1.0 / (ff_hid_dim ** 0.5)
    w1 = jax.random.uniform(k1, (input_dim, ff_hid_dim), dtype, -bnd1, bnd1)
    b1 = jax.random.uniform(k2, (1, ff_hid_dim), dtype, -bnd1, bnd1)
    w2 = jax.random.uniform(k3, (ff_hid_dim, input_dim), dtype, -bnd2, bnd2)
    b2 = jax.random.uniform(k4, (1, input_dim), dtype, -bnd2, bnd2)
    return w1, b1, w2, b2


if __name__ == "__main__":
    key = jax.random.PRNGKey(0)
    kx, kp = jax.random.split(key)

    batch, seq, input_dim, mult = 2, 8, 32, 4.0   # hidden = 128
    x = jax.random.normal(kx, (batch, seq, input_dim), jnp.float32)
    w1, b1, w2, b2 = init_params(kp, input_dim, mult)

    x2 = x.reshape(-1, input_dim)
    ref_f32 = (jnp.maximum(x2 @ w1 + b1, 0.0) @ w2 + b2).reshape(batch, seq, input_dim)

    # 1) f32 compute path (scratch-free, accumulate into o_ref): tight correctness check.
    p_f32 = prepare_params(w1, b1, w2, b2, compute_dtype=jnp.float32)
    out_f32 = jax.block_until_ready(feed_forward(x, p_f32))
    assert out_f32.shape == (batch, seq, input_dim)
    assert jnp.allclose(out_f32, ref_f32, atol=1e-4, rtol=1e-4)

    # 2) Default fast path: bf16 operands cast once in prepare_params, f32 accumulation.
    p_bf = prepare_params(w1, b1, w2, b2, compute_dtype=jnp.bfloat16)
    out_bf = jax.block_until_ready(feed_forward(x, p_bf))
    xb = x2.astype(jnp.bfloat16)
    w1b = w1.astype(jnp.bfloat16)
    w2b = w2.astype(jnp.bfloat16)
    h_ref = jnp.maximum(jnp.dot(xb, w1b, preferred_element_type=jnp.float32) + b1, 0.0)
    ref_bf = (jnp.dot(h_ref.astype(jnp.bfloat16), w2b, preferred_element_type=jnp.float32) + b2)
    ref_bf = ref_bf.reshape(batch, seq, input_dim)
    assert out_bf.shape == (batch, seq, input_dim)
    assert jnp.allclose(out_bf, ref_bf, atol=1e-2, rtol=1e-2)

    # 3) bf16 input/output (exercises the f32 scratch-accumulator variant).
    out_bf_io = jax.block_until_ready(feed_forward(x.astype(jnp.bfloat16), p_bf))
    assert out_bf_io.dtype == jnp.bfloat16
    assert jnp.allclose(out_bf_io.astype(jnp.float32), ref_bf, atol=5e-2, rtol=5e-2)

    print("KERNEL_OK")
</pallas_src>

<mosaic_0001>
module attributes {stable_mosaic.version = 11 : i64} {
  func.func @_ff_kernel_accum_out(%arg0: i32, %arg1: i32, %arg2: memref<8x128xf32, #tpu.memory_space<vmem>>, %arg3: memref<128x128xf32, #tpu.memory_space<vmem>>, %arg4: memref<1x128xf32, #tpu.memory_space<vmem>>, %arg5: memref<128x128xf32, #tpu.memory_space<vmem>>, %arg6: memref<1x128xf32, #tpu.memory_space<vmem>>, %arg7: memref<8x128xf32, #tpu.memory_space<vmem>>) attributes {dimension_semantics = [#tpu.dimension_semantics<parallel>, #tpu.dimension_semantics<arbitrary>], iteration_bounds = array<i64: 2, 1>, scalar_prefetch = 0 : i64, scratch_operands = 0 : i64, tpu.core_type = #tpu.core_type<tc>, window_params = [{transform_indices = @transform_0, window_bounds = array<i64: 8, 128>}, {transform_indices = @transform_1, window_bounds = array<i64: 128, 128>}, {transform_indices = @transform_2, window_bounds = array<i64: 1, 128>}, {transform_indices = @transform_3, window_bounds = array<i64: 128, 128>}, {pipeline_mode = #tpu.pipeline_mode<synchronous>, transform_indices = @transform_4, window_bounds = array<i64: 1, 128>}, {transform_indices = @transform_5, window_bounds = array<i64: 8, 128>}]} {
    %c0 = arith.constant 0 : index
    %c0_0 = arith.constant 0 : index
    %0 = vector.load %arg2[%c0, %c0_0] : memref<8x128xf32, #tpu.memory_space<vmem>>, vector<8x128xf32>
    %c0_1 = arith.constant 0 : index
    %c0_2 = arith.constant 0 : index
    %1 = vector.load %arg3[%c0_1, %c0_2] : memref<128x128xf32, #tpu.memory_space<vmem>>, vector<128x128xf32>
    %cst = arith.constant dense<0.000000e+00> : vector<8x128xf32>
    %2 = tpu.matmul %0, %1, %cst {dimension_numbers = #tpu.dot_dimension_numbers<[1], [0], [0], [1], [0, 0, 1, 1], [], []>} : vector<8x128xf32>, vector<128x128xf32>, vector<8x128xf32> -> vector<8x128xf32>
    %c0_3 = arith.constant 0 : index
    %c0_4 = arith.constant 0 : index
    %3 = vector.load %arg4[%c0_3, %c0_4] : memref<1x128xf32, #tpu.memory_space<vmem>>, vector<1x128xf32>
    %4 = vector.broadcast %3 : vector<1x128xf32> to vector<8x128xf32>
    %5 = arith.addf %2, %4 : vector<8x128xf32>
    %cst_5 = arith.constant 0.000000e+00 : f32
    %6 = vector.broadcast %cst_5 : f32 to vector<8x128xf32>
    %7 = arith.maximumf %5, %6 : vector<8x128xf32>
    %c0_6 = arith.constant 0 : index
    %c0_7 = arith.constant 0 : index
    %8 = vector.load %arg5[%c0_6, %c0_7] : memref<128x128xf32, #tpu.memory_space<vmem>>, vector<128x128xf32>
    %cst_8 = arith.constant dense<0.000000e+00> : vector<8x128xf32>
    %9 = tpu.matmul %7, %8, %cst_8 {dimension_numbers = #tpu.dot_dimension_numbers<[1], [0], [0], [1], [0, 0, 1, 1], [], []>} : vector<8x128xf32>, vector<128x128xf32>, vector<8x128xf32> -> vector<8x128xf32>
    %c0_i32 = arith.constant 0 : i32
    %10 = arith.cmpi eq, %arg1, %c0_i32 : i32
    %11 = arith.extui %10 : i1 to i32
    %c0_i32_9 = arith.constant 0 : i32
    %12 = arith.cmpi ne, %11, %c0_i32_9 : i32
    scf.if %12 {
      %c0_14 = arith.constant 0 : index
      %c0_15 = arith.constant 0 : index
      %19 = vector.load %arg7[%c0_14, %c0_15] : memref<8x128xf32, #tpu.memory_space<vmem>>, vector<8x128xf32>
      tpu.vector_store %arg7[%c0_14, %c0_15], %9 {strides = array<i32>} : memref<8x128xf32, #tpu.memory_space<vmem>>, vector<8x128xf32>,
    } else {
    }
    %c0_i32_10 = arith.constant 0 : i32
    %13 = arith.cmpi sgt, %arg1, %c0_i32_10 : i32
    %14 = arith.extui %13 : i1 to i32
    %c0_i32_11 = arith.constant 0 : i32
    %15 = arith.cmpi ne, %14, %c0_i32_11 : i32
    scf.if %15 {
      %c0_14 = arith.constant 0 : index
      %c0_15 = arith.constant 0 : index
      %19 = vector.load %arg7[%c0_14, %c0_15] : memref<8x128xf32, #tpu.memory_space<vmem>>, vector<8x128xf32>
      %20 = arith.addf %19, %9 : vector<8x128xf32>
      %c0_16 = arith.constant 0 : index
      %c0_17 = arith.constant 0 : index
      %21 = vector.load %arg7[%c0_16, %c0_17] : memref<8x128xf32, #tpu.memory_space<vmem>>, vector<8x128xf32>
      tpu.vector_store %arg7[%c0_16, %c0_17], %20 {strides = array<i32>} : memref<8x128xf32, #tpu.memory_space<vmem>>, vector<8x128xf32>,
    } else {
    }
    %c0_i32_12 = arith.constant 0 : i32
    %16 = arith.cmpi eq, %arg1, %c0_i32_12 : i32
    %17 = arith.extui %16 : i1 to i32
    %c0_i32_13 = arith.constant 0 : i32
    %18 = arith.cmpi ne, %17, %c0_i32_13 : i32
    scf.if %18 {
      %c0_14 = arith.constant 0 : index
      %c0_15 = arith.constant 0 : index
      %19 = vector.load %arg7[%c0_14, %c0_15] : memref<8x128xf32, #tpu.memory_space<vmem>>, vector<8x128xf32>
      %c0_16 = arith.constant 0 : index
      %c0_17 = arith.constant 0 : index
      %20 = vector.load %arg6[%c0_16, %c0_17] : memref<1x128xf32, #tpu.memory_space<vmem>>, vector<1x128xf32>
      %21 = vector.broadcast %20 : vector<1x128xf32> to vector<8x128xf32>
      %22 = arith.addf %19, %21 : vector<8x128xf32>
      %c0_18 = arith.constant 0 : index
      %c0_19 = arith.constant 0 : index
      %23 = vector.load %arg7[%c0_18, %c0_19] : memref<8x128xf32, #tpu.memory_space<vmem>>, vector<8x128xf32>
      tpu.vector_store %arg7[%c0_18, %c0_19], %22 {strides = array<i32>} : memref<8x128xf32, #tpu.memory_space<vmem>>, vector<8x128xf32>,
    } else {
    }
    return
  }
  func.func @transform_0(%arg0: i32, %arg1: i32) -> (i32, i32) {
    %c0_i32 = arith.constant 0 : i32
    %c0_i32_0 = arith.constant 0 : i32
    return %arg0, %c0_i32 : i32, i32
  }
  func.func @transform_1(%arg0: i32, %arg1: i32) -> (i32, i32) {
    %c0_i32 = arith.constant 0 : i32
    %c0_i32_0 = arith.constant 0 : i32
    return %c0_i32, %arg1 : i32, i32
  }
  func.func @transform_2(%arg0: i32, %arg1: i32) -> (i32, i32) {
    %c0_i32 = arith.constant 0 : i32
    %c0_i32_0 = arith.constant 0 : i32
    return %c0_i32, %arg1 : i32, i32
  }
  func.func @transform_3(%arg0: i32, %arg1: i32) -> (i32, i32) {
    %c0_i32 = arith.constant 0 : i32
    %c0_i32_0 = arith.constant 0 : i32
    return %arg1, %c0_i32 : i32, i32
  }
  func.func @transform_4(%arg0: i32, %arg1: i32) -> (i32, i32) {
    %c0_i32 = arith.constant 0 : i32
    %c0_i32_0 = arith.constant 0 : i32
    %c0_i32_1 = arith.constant 0 : i32
    return %c0_i32, %c0_i32_0 : i32, i32
  }
  func.func @transform_5(%arg0: i32, %arg1: i32) -> (i32, i32) {
    %c0_i32 = arith.constant 0 : i32
    %c0_i32_0 = arith.constant 0 : i32
    return %arg0, %c0_i32 : i32, i32
  }
}

</mosaic_0001>

<bundles_post_ra>
// kernel: tpu_custom_call.1
= control target key start
LH: loop header
LB: loop body
LE: loop exit
PB: predicated region body
PF: predicated region fallthrough
CT: control target
= control target key end

     0   :  { %10 = vsyncpa [#allocation3], 0  ;;  %s1396_s0 = inlined_call_operand.hbm [shape: f32[16,128], index: 0, kind: input, shape index: {}]   ;;  %s1397_s1 = inlined_call_operand.hbm [shape: f32[128,128], index: 1, kind: input, shape index: {}]   ;;  %s1398_s2 = inlined_call_operand.vmem [shape: f32[1,128], index: 2, kind: input, shape index: {}]   ;;  %s1399_s3 = inlined_call_operand.hbm [shape: f32[128,128], index: 3, kind: input, shape index: {}]   ;;  %s1400_s4 = inlined_call_operand.vmem [shape: f32[1,128], index: 4, kind: input, shape index: {}]   ;;  %s1401_s5 = inlined_call_operand.hbm [shape: f32[16,128], index: 5, kind: output, shape index: {}]  }
   0x1   :  { %12 = vsyncpa [#allocation3 + $0x1], 0 }
   0x2   :  { %13 = vsyncpa [#allocation6], 0 }
   0x3   :  { %14 = vsyncpa [#allocation4], 0 }
   0x4   :  { %16 = vsyncpa [#allocation4 + $0x1], 0  ;;  %s1117_s18 = smov 0   ;;  %s1119_s19 = smov 0  }
   0x5   :  { %s1121_s20 = smov 0   ;;  %s1123_s21 = smov 0  }
   0x6   :  { %s1125_s22 = smov 0   ;;  %s1127_s23 = smov 0  }
   0x7 LB: > { %s644_s24 = sadd.s32 4294967295, %s1076_s23   ;;  %s645_s25 = sadd.s32 4294967294, %s1076_s23   ;;  %s1076_s23 = sphi %s1127_s23, %s22_s23   ;;  %s1072_s22 = sphi %s1125_s22, %s1423_s22   ;;  %s1068_s21 = sphi %s1123_s21, %s1422_s21   ;;  %s1064_s20 = sphi %s1121_s20, %s1421_s20   ;;  %s1060_s19 = sphi %s1119_s19, %s1420_s19   ;;  %s1056_s18 = sphi %s1117_s18, %s1419_s18  }
   0x8   : > { %p54_p0 = scmp.ne.s32.totalorder %s1060_s19, %s1056_s18  ;;  %p1151_p1 = scmp.eq.s32.totalorder %s644_s24, 0 }
   0x9   : > { %p1155_p2 = scmp.eq.s32.totalorder %s644_s24, 1  ;;  %p183_p3 = scmp.eq.s32.totalorder %s645_s25, 1 }
   0xa   : > { %s1406_s26 = scalar_select %p1151_p1, 1, 0 }
   0xb   : > { %p1161_p4 = por %p1151_p1, %p54_p0  ;;  %p646_p5 = scmp.ge.s32.totalorder %s1076_s23, 1 }
   0xc   : > { %p1166_p6 = por %p183_p3, %p54_p0  ;;  %p190_p7 = scmp.lt.s32.totalorder %s1076_s23, 3 }
   0xd   : > { %s1408_s28 = scalar_select %p1161_p4, 1, 0 }
   0xe   : > { %s1409_s29 = scalar_select %p1166_p6, 1, 0 }
   0xf   : > { %p1171_p8 = pnand %p646_p5, %p190_p7  ;;  %s1078_s6 = smov [#allocation5]  }
  0x10   : > { %s204_s7 = sshll.u32 %s1078_s6, 4  ;;  %s1079_s9 = smov [#allocation7]   ;;  %s1175_s7 = int_to_ptr.vmem [resolvable:$true] %s204_s7 }
  0x11   : > { %p828_p9 = pneg %p1171_p8  ;;  %s226_s10 = sshll.u32 %s1079_s9, 4  ;;  %s1186_s10 = int_to_ptr.vmem [resolvable:$true] %s226_s10 }
  0x12   : > { %s904_s13 = scalar_lea.hbm %s1397_s1, 2048 }
  0x13   : > { %p1182_p11 = pnand %p828_p9, %p1151_p1  ;;  %p905_p12 = scmp.ne.s32.totalorder %s1397_s1, %s904_s13 }
  0x14   : > { %p911_p5 = scmp.lt.u32.totalorder %s904_s13, %s1397_s1 }
  0x15   : > { %p906_p13 = pneg %p1182_p11 }
  0x17   : > { %p907_p0 = pnand %p906_p13, %p905_p12 }
  0x19   : > { %p908_p3 = pneg %p907_p0 }
  0x1b   : > { %p913_p7 = pnand %p911_p5, %p908_p3 }
  0x1d   : > { %916 = shalt.err (!%p913_p7)
}
  0x1e   : > { %s917_s24 = scalar_lea.vmem %s1175_s7, 2048  ;;  %p925_p1 = scmp.lt.s32.totalorder %s1175_s7, %s1175_s7 }
  0x1f   : > { %p918_p9 = scmp.ne.s32.totalorder %s1175_s7, %s917_s24  ;;  %p926_p12 = scmp.lt.s32.totalorder %s917_s24, %s917_s24 }
  0x21   : > { %p920_p10 = pnand %p918_p9, %p906_p13  ;;  %p927_p0 = por %p926_p12, %p925_p1 }
  0x23   : > { %p921_p6 = pneg %p920_p10 }
  0x25   : > { %p928_p4 = pnand %p927_p0, %p921_p6 }
  0x27   : > { %931 = shalt.err (!%p928_p4)
}
  0x28   : > { %s1080_s25 = smov 128   ;;  %s1081_s6 = smov 8  }
  0x29   : > { %831 = dma.hbm_to_vmem [thread:$0]  (!%p1182_p11), %s1397_s1, 2048, %s1175_s7, [#allocation6], %s1080_s25, %s1080_s25, %s1081_s6  }
  0x2a   : > { %s932_s14 = scalar_lea.hbm %s1399_s3, 2048 }
  0x2b   : > { %p933_p1 = scmp.ne.s32.totalorder %s1399_s3, %s932_s14  ;;  %p939_p10 = scmp.lt.u32.totalorder %s932_s14, %s1399_s3 }
  0x2d   : > { %p935_p4 = pnand %p933_p1, %p906_p13 }
  0x2f   : > { %p936_p6 = pneg %p935_p4 }
  0x31   : > { %p941_p3 = pnand %p939_p10, %p936_p6 }
  0x33   : > { %944 = shalt.err (!%p941_p3)
}
  0x34   : > { %s945_s7 = scalar_lea.vmem %s1186_s10, 2048  ;;  %p953_p12 = scmp.lt.s32.totalorder %s1186_s10, %s1186_s10 }
  0x35   : > { %p946_p5 = scmp.ne.s32.totalorder %s1186_s10, %s945_s7  ;;  %p954_p0 = scmp.lt.s32.totalorder %s945_s7, %s945_s7 }
  0x37   : > { %p948_p7 = pnand %p946_p5, %p906_p13  ;;  %p955_p1 = por %p954_p0, %p953_p12 }
  0x39   : > { %p949_p9 = pneg %p948_p7 }
  0x3b   : > { %p956_p4 = pnand %p955_p1, %p949_p9 }
  0x3d   : > { %959 = shalt.err (!%p956_p4)
}
  0x3e   : > { %834 = dma.hbm_to_vmem [thread:$0]  (!%p1182_p11), %s1399_s3, 2048, %s1186_s10, [#allocation6], %s1080_s25, %s1080_s25, %s1081_s6  }
  0x3f   : > { %s34_s12 = sadd.s32 1, %s1072_s22  ;;  %s41_s13 = sadd.s32 1, %s1064_s20 }
  0x40   : > { %p36_p13 = scmp.ge.s32.totalorder %s34_s12, 2  ;;  %p48_p6 = scmp.ne.s32.totalorder %s1064_s20, %s1060_s19 }
  0x41   : > { %p49_p10 = scmp.eq.s32.totalorder %s1076_s23, 0  ;;  %p845_p3 = scmp.lt.s32.totalorder %s1076_s23, 2 }
  0x42   : > { %s1425_s12 = smov (%p36_p13, %s34_s12), 0  ;;  %p1250_p7 = por %p1155_p2, %p48_p6 }
  0x43   : > { %p50_p5 = por %p49_p10, %p48_p6  ;;  %s38_s14 = ssub.s32 %s1072_s22, %s1425_s12 }
  0x44   : > { %s1412_s8 = scalar_select %p1250_p7, 1, 0 }
  0x45   : > { %s243_s15 = sand.u32 1, %s1064_s20   ;;  %p39_p9 = scmp.eq.s32.totalorder %s38_s14, 0 }
  0x46   : > { %s651_s10 = sshll.u32 %s243_s15, 3  ;;  %s652_s25 = sshll.u32 %s1072_s22, 7 }
  0x47   : > { %s1259_s6 = scalar_select %p39_p9, %s1064_s20, %s41_s13  }
  0x48   : > { %s1264_s24 = scalar_lea.hbm %s1396_s0, %s652_s25  ;;  %s247_s27 = scalar_lea.vmem [#allocation2], %s651_s10 }
  0x49   : > { %s254_s7 = sshll.u32 %s247_s27, 4  ;;  %p1268_p2 = pnand %p845_p3, %p50_p5  ;;  %s1272_s7 = int_to_ptr.vmem [resolvable:$true] %s254_s7 }
  0x4a   : > { %s244_s11 = scalar_lea.sflag [#allocation3], %s243_s15  ;;  %s960_s13 = scalar_lea.hbm %s1264_s24, 128 }
  0x4b   : > { %p961_p11 = scmp.ne.s32.totalorder %s1264_s24, %s960_s13  ;;  %p962_p12 = pneg %p1268_p2 }
  0x4c   : > { %s965_s25 = scalar_lea.hbm %s1396_s0, 256  ;;  %p966_p4 = scmp.lt.u32.totalorder %s1264_s24, %s1396_s0 }
  0x4d   : > { %p963_p0 = pnand %p962_p12, %p961_p11  ;;  %p967_p13 = scmp.lt.u32.totalorder %s965_s25, %s960_s13 }
  0x4e   : > { %p969_p10 = scmp.lt.u32.totalorder %s960_s13, %s1264_s24 }
  0x4f   : > { %p964_p1 = pneg %p963_p0  ;;  %p968_p6 = por %p967_p13, %p966_p4 }
  0x51   : > { %p970_p3 = por %p969_p10, %p968_p6 }
  0x53   : > { %p971_p5 = pnand %p970_p3, %p964_p1 }
  0x55   : > { %974 = shalt.err (!%p971_p5)
}
  0x56   : > { %s975_s15 = scalar_lea.vmem %s1272_s7, 128  ;;  %s1082_s27 = smov [#allocation2]  }
  0x57   : > { %p976_p9 = scmp.ne.s32.totalorder %s1272_s7, %s975_s15  ;;  %s980_s14 = sshll.u32 %s1082_s27, 4  ;;  %s981_s14 = int_to_ptr.vmem [resolvable:$false] %s980_s14 }
  0x58   : > { %s982_s10 = scalar_lea.vmem %s981_s14, 256  ;;  %p983_p7 = scmp.lt.s32.totalorder %s1272_s7, %s981_s14 }
  0x59   : > { %p978_p11 = pnand %p976_p9, %p962_p12  ;;  %p984_p4 = scmp.lt.s32.totalorder %s982_s10, %s975_s15 }
  0x5b   : > { %p979_p0 = pneg %p978_p11  ;;  %p985_p13 = por %p984_p4, %p983_p7 }
  0x5d   : > { %p986_p6 = pnand %p985_p13, %p979_p0 }
  0x5f   : > { %989 = shalt.err (!%p986_p6)
}
  0x60   : > { %838 = dma.hbm_to_vmem [thread:$0]  (!%p1268_p2), %s1264_s24, 128, %s1272_s7, %s244_s11  }
  0x61   : > { %263 = sbr.rel (%p1171_p8) target bundleno = 587 (0x24b), region = 40  ;;  %s1302_s13 = sand.u32 (!%p1171_p8), 1, %s1060_s19  }
  0x62   : > { %s654_s25 = sshll.u32 (!%p1171_p8), %s1302_s13, 3  ;;  %s266_s16 = scalar_lea.sflag (!%p1171_p8), [#allocation3], %s1302_s13 }
  0x63   : > { %s1308_s17 = scalar_lea.vmem (!%p1171_p8), [#allocation2], %s654_s25  ;;  %p1414_p7 = scmp.ne.s32.totalorder (!%p1171_p8), %s1408_s28, 0 }
  0x68   : > { %1043 = dma.done.wait (%p1414_p7), %s266_s16, 128  }
  0x69   : > { %1045 = vsyncadd (%p1414_p7), %s266_s16, 4294967168  ;;  %p1415_p2 = scmp.ne.s32.totalorder %s1406_s26, 0 }
  0x6b   : > { %1047 = dma.done.wait (%p1415_p2), [#allocation6], 4096  }
  0x6c   : > { %1049 = vsyncadd (%p1415_p2), [#allocation6], 4294963200  ;;  %v1083_v0 = vmov 0.0|0.0   ;;  %vm1084_vm0 = vmmov 0   ;;  %v1085_v1 = vmov 0.0   ;;  %v312_v2 = vld [vmem:[#allocation5] sm:$0xff] }
  0x6d   : > { %768 = vmatprep.subr.bf16.mxu0 %v1083_v0  ;;  %730 = vmatprep.mubr.msk.f32.mxu0 %vm1084_vm0, %v1085_v1  ;;  %v313_v3 = vld [vmem:[#allocation5 + $0x8] sm:$0xff]  ;;  %v314_v4 = vld [vmem:[#allocation5 + $0x10] sm:$0xff]  ;;  %v315_v6 = vld [vmem:[#allocation5 + $0x18] sm:$0xff]  ;;  %s661_s7 = sshll.u32 %s1068_s21, 7  ;;  %s306_s9 = scalar_lea.vmem [#allocation8], %s654_s25 }
  0x6e   : > { %792 = vmatprep.subr.bf16.mxu1 %v1083_v0  ;;  %765 = vmatprep.mubr.msk.f32.mxu1 %vm1084_vm0, %v1085_v1  ;;  %v769_v5 = vpack.c.bf16 %v313_v3, %v312_v2  ;;  %v772_v7 = vpack.c.bf16 %v315_v6, %v314_v4  ;;  %v316_v8 = vld [vmem:[#allocation5 + $0x20] sm:$0xff]  ;;  %v317_v9 = vld [vmem:[#allocation5 + $0x28] sm:$0xff]  ;;  %v408_v12 = vld [vmem:[#allocation7 + $0x10] sm:$0xff]  ;;  %s531_s11 = sshll.u32 %s306_s9, 4  ;;  %s1347_s14 = scalar_lea.hbm %s1401_s5, %s661_s7  ;;  %s1349_s11 = int_to_ptr.vmem [resolvable:$true] %s531_s11 }
  0x6f   : > { %v406_v10 = vld [vmem:[#allocation7] sm:$0xff]  ;;  %v407_v11 = vld [vmem:[#allocation7 + $0x8] sm:$0xff]  ;;  %v409_v13 = vld [vmem:[#allocation7 + $0x18] sm:$0xff]  ;;  %v775_v14 = vpack.c.bf16 %v317_v9, %v316_v8  ;;  %s518_s10 = scalar_lea.sflag [#allocation4], %s1302_s13  ;;  %s990_s16 = scalar_lea.vmem %s1349_s11, 128 }
  0x70   : > { %770 = vmatpush3.bf16.msra.mxu0 %v769_v5  ;;  %v793_v15 = vpack.c.bf16 %v407_v11, %v406_v10  ;;  %v318_v16 = vld [vmem:[#allocation5 + $0x30] sm:$0xff]  ;;  %v319_v17 = vld [vmem:[#allocation5 + $0x38] sm:$0xff]  ;;  %v796_v18 = vpack.c.bf16 %v409_v13, %v408_v12  ;;  %v410_v19 = vld [vmem:[#allocation7 + $0x20] sm:$0xff]  ;;  %p991_p8 = scmp.ne.s32.totalorder %s1349_s11, %s990_s16  ;;  %p1416_p12 = scmp.ne.s32.totalorder %s1412_s8, 0 }
  0x71   : > { %771 = vmatprep.subr.bf16.mxu0 %v1083_v0  ;;  %v411_v20 = vld [vmem:[#allocation7 + $0x28] sm:$0xff]  ;;  %v778_v21 = vpack.c.bf16 %v319_v17, %v318_v16  ;;  %v320_v22 = vld [vmem:[#allocation5 + $0x40] sm:$0xff]  ;;  %v412_v25 = vld [vmem:[#allocation7 + $0x30] sm:$0xff]  ;;  %s1086_s21 = smov [#allocation8]  }
  0x72   : > { %794 = vmatpush3.bf16.msra.mxu1 %v793_v15  ;;  %v321_v23 = vld [vmem:[#allocation5 + $0x48] sm:$0xff]  ;;  %v799_v24 = vpack.c.bf16 %v411_v20, %v410_v19  ;;  %v413_v26 = vld [vmem:[#allocation7 + $0x38] sm:$0xff]  ;;  %v322_v28 = vld [vmem:[#allocation5 + $0x50] sm:$0xff]  ;;  %p992_p1 = pnand %p991_p8, %p1416_p12  ;;  %s994_s25 = sshll.u32 %s1086_s21, 4  ;;  %s995_s25 = int_to_ptr.vmem [resolvable:$false] %s994_s25 }
  0x73   : > { %795 = vmatprep.subr.bf16.mxu1 %v1083_v0  ;;  %v781_v27 = vpack.c.bf16 %v321_v23, %v320_v22  ;;  %v323_v29 = vld [vmem:[#allocation5 + $0x58] sm:$0xff]  ;;  %v802_v30 = vpack.c.bf16 %v413_v26, %v412_v25  ;;  %v414_v31 = vld [vmem:[#allocation7 + $0x40] sm:$0xff]  ;;  %v415_v32 = vld [vmem:[#allocation7 + $0x48] sm:$0xff]  ;;  %p997_p3 = scmp.lt.s32.totalorder %s1349_s11, %s995_s25 }
  0x74   : > { %773 = vmatpush3.bf16.msra.mxu0 %v772_v7  ;;  %v784_v33 = vpack.c.bf16 %v323_v29, %v322_v28  ;;  %v324_v34 = vld [vmem:[#allocation5 + $0x60] sm:$0xff]  ;;  %v325_v35 = vld [vmem:[#allocation5 + $0x68] sm:$0xff]  ;;  %v805_v36 = vpack.c.bf16 %v415_v32, %v414_v31  ;;  %v416_v37 = vld [vmem:[#allocation7 + $0x50] sm:$0xff]  ;;  %p993_p10 = pneg %p992_p1 }
  0x75   : > { %774 = vmatprep.subr.bf16.mxu0 %v1083_v0  ;;  %v417_v38 = vld [vmem:[#allocation7 + $0x58] sm:$0xff]  ;;  %v787_v39 = vpack.c.bf16 %v325_v35, %v324_v34  ;;  %v326_v40 = vld [vmem:[#allocation5 + $0x70] sm:$0xff]  ;;  %v418_v43 = vld [vmem:[#allocation7 + $0x60] sm:$0xff] }
  0x76   : > { %797 = vmatpush3.bf16.msra.mxu1 %v796_v18  ;;  %v327_v41 = vld [vmem:[#allocation5 + $0x78] sm:$0xff]  ;;  %v808_v42 = vpack.c.bf16 %v417_v38, %v416_v37  ;;  %v419_v44 = vld [vmem:[#allocation7 + $0x68] sm:$0xff]  ;;  %v420_v48 = vld [vmem:[#allocation7 + $0x70] sm:$0xff] }
  0x77   : > { %798 = vmatprep.subr.bf16.mxu1 %v1083_v0  ;;  %v790_v45 = vpack.c.bf16 %v327_v41, %v326_v40  ;;  %v811_v46 = vpack.c.bf16 %v419_v44, %v418_v43  ;;  %v311_v47 = vld [vmem:[%s1308_s17] sm:$0xff]  ;;  %s996_s17 = scalar_lea.vmem %s995_s25, 256 }
  0x78   : > { %776 = vmatpush3.bf16.msra.mxu0 %v775_v14  ;;  %v421_v49 = vld [vmem:[#allocation7 + $0x78] sm:$0xff]  ;;  %v658_v51 = vld [vmem:[%s1398_s2] ss:$0 sm:$0xff]  ;;  %p998_p5 = scmp.lt.s32.totalorder %s996_s17, %s990_s16 }
  0x79   : > { %777 = vmatprep.subr.bf16.mxu0 %v1083_v0  ;;  %v814_v50 = vpack.c.bf16 %v421_v49, %v420_v48  ;;  %v659_v56 = vld [vmem:[%s1400_s4] ss:$0 sm:$0xff] }
  0x7a   : > { %800 = vmatpush3.bf16.msra.mxu1 %v799_v24  ;;  %p999_p9 = por %p998_p5, %p997_p3 }
  0x7b   : > { %801 = vmatprep.subr.bf16.mxu1 %v1083_v0 }
  0x7c   : > { %779 = vmatpush3.bf16.msra.mxu0 %v778_v21  ;;  %p1000_p11 = pnand %p999_p9, %p993_p10 }
  0x7d   : > { %780 = vmatprep.subr.bf16.mxu0 %v1083_v0 }
  0x7e   : > { %803 = vmatpush3.bf16.msra.mxu1 %v802_v30 }
  0x7f   : > { %804 = vmatprep.subr.bf16.mxu1 %v1083_v0 }
  0x80   : > { %782 = vmatpush3.bf16.msra.mxu0 %v781_v27 }
  0x81   : > { %783 = vmatprep.subr.bf16.mxu0 %v1083_v0 }
  0x82   : > { %806 = vmatpush3.bf16.msra.mxu1 %v805_v36 }
  0x83   : > { %807 = vmatprep.subr.bf16.mxu1 %v1083_v0 }
  0x84   : > { %785 = vmatpush3.bf16.msra.mxu0 %v784_v33 }
  0x85   : > { %786 = vmatprep.subr.bf16.mxu0 %v1083_v0 }
  0x86   : > { %809 = vmatpush3.bf16.msra.mxu1 %v808_v42 }
  0x87   : > { %810 = vmatprep.subr.bf16.mxu1 %v1083_v0 }
  0x88   : > { %788 = vmatpush3.bf16.msra.mxu0 %v787_v39 }
  0x89   : > { %789 = vmatprep.subr.bf16.mxu0 %v1083_v0 }
  0x8a   : > { %812 = vmatpush3.bf16.msra.mxu1 %v811_v46 }
  0x8b   : > { %813 = vmatprep.subr.bf16.mxu1 %v1083_v0 }
  0x8c   : > { %791 = vmatpush3.bf16.msra.mxu0 %v790_v45 }
  0x8e   : > { %815 = vmatpush3.bf16.msra.mxu1 %v814_v50 }
  0x8f   : > { %731 = vmatmul.mubr.f32.vlgmr.msra.gmra.mrb[0].mxu0 %v311_v47 }
 0x162   : > { %v401_v52 = vpop.f32.mrb[0].mxu0 }
 0x163   : > { %v402_v53 = vadd.f32 %v658_v51, %v401_v52  ;;  %v732_v54 = vpop.f32.mrb[1].mxu0 }
 0x165   : > { %v405_v55 = vmax.f32 %v402_v53, 0.0 }
 0x167   : > { %766 = vmatmul.mubr.f32.vlgmr.msra.gmra.mrb[0].mxu1 %v405_v55 }
 0x23a   : > { %v488_v57 = vpop.f32.mrb[0].mxu1 }
 0x23b   : > { %v515_v58 = vadd.f32 %v659_v56, %v488_v57  ;;  %v767_v59 = vpop.f32.mrb[1].mxu1 }
 0x23d   : > { %516 = vst [vmem:[%s306_s9] sm:$0xff] %v515_v58 }
 0x23e   : > { %1003 = shalt.err (!%p1000_p11)
}
 0x23f   : > { %s1004_s13 = scalar_lea.hbm %s1347_s14, 128  ;;  %s1008_s30 = scalar_lea.hbm %s1401_s5, 256 }
 0x240   : > { %p1005_p0 = scmp.ne.s32.totalorder %s1347_s14, %s1004_s13  ;;  %p1009_p6 = scmp.lt.u32.totalorder %s1347_s14, %s1401_s5 }
 0x241   : > { %p1010_p7 = scmp.lt.u32.totalorder %s1008_s30, %s1004_s13  ;;  %p1012_p8 = scmp.lt.u32.totalorder %s1004_s13, %s1347_s14 }
 0x242   : > { %p1006_p4 = pnand %p1005_p0, %p1416_p12 }
 0x243   : > { %p1011_p2 = por %p1010_p7, %p1009_p6 }
 0x244   : > { %p1007_p13 = pneg %p1006_p4 }
 0x245   : > { %p1013_p1 = por %p1012_p8, %p1011_p2 }
 0x247   : > { %p1014_p10 = pnand %p1013_p1, %p1007_p13 }
 0x249   : > { %1017 = shalt.err (!%p1014_p10)
}
 0x24a   : > { %826 = dma.vmem_to_hbm [thread:$0]  (%p1416_p12), %s1349_s11, 128, %s1347_s14, %s518_s10  }
 0x24b PF: > { %s543_s9 = sand.u32 1, %s1056_s18   ;;  %p1417_p3 = scmp.ne.s32.totalorder %s1409_s29, 0 }
 0x24c   : > { %p1418_p5 = scmp.ge.s32.totalorder %s1076_s23, 2  ;;  %s544_s15 = scalar_lea.sflag [#allocation4], %s543_s9 }
 0x24e   : > { %p840_p9 = pnand %p1418_p5, %p1417_p3 }
 0x250   : > { %1051 = dma.done.wait (!%p840_p9), %s544_s15, 128  }
 0x251   : > { %1053 = vsyncadd (!%p840_p9), %s544_s15, 4294967168  ;;  %s22_s23 = sadd.s32 1, %s1076_s23   ;;  %s1419_s18 = smov %s1060_s19 }
 0x252   : > { %p19_p11 = scmp.ge.s32.totalorder %s22_s23, 4   ;;  %s1420_s19 = smov %s1064_s20 }
 0x253   : > { %s1421_s20 = smov %s1259_s6  ;;  %s1422_s21 = smov %s1072_s22 }
 0x254   : > { %s1423_s22 = smov %s1425_s12  ;;  %21 = sbr.rel (!%p19_p11) target bundleno = 7 (0x7), region = 110 }
 0x25b   :  { %549 = vsyncpa [#allocation3], 1 }
 0x25c   :  { %551 = vsyncpa [#allocation3 + $0x1], 1 }
 0x25d   :  { %552 = vsyncpa [#allocation6], 1 }
 0x25e   :  { %553 = vsyncpa [#allocation4], 1 }
 0x25f   :  { %555 = vsyncpa [#allocation4 + $0x1], 1 }

</bundles_post_ra>
